<compile_context>
chip_gen: v6e
topology: v6e:2x2x1
jax: 0.10.0
libtpu: 0.0.40
codegen_flags: <defaults>
</compile_context>

<pallas_src>
import jax
import jax.numpy as jnp
from jax import lax
from jax.experimental import pallas as pl
from jax.experimental.pallas import tpu as pltpu

INPUT_DIM = 6
OUTPUT_DIM = 1
NUM_HOL = 30
EMBED_DIM = 8
A, B_, C_ = 256, 64, 32  # hidden sizes (a, b, c in the torch script)


def _round_up(n, m):
    return ((n + m - 1) // m) * m


XPAD = _round_up(INPUT_DIM, 8)   # 8  : dense-feature rows in the stacked operand
HPAD = _round_up(NUM_HOL, 8)     # 32 : holiday-count rows in the stacked operand
KSTACK = XPAD + HPAD             # 40 : merged layer-1 contraction dim


def nn_model_kernel(x_ref, ids_ref, w1s_ref, b1_ref, w2_ref, b2_ref,
                    w3_ref, b3_ref, w4_ref, b4_ref, out_ref, stk_ref):
    dt = w1s_ref.dtype                      # MXU operand dtype (bf16 or f32)
    edt = b1_ref.dtype                      # element-wise dtype (bf16 on v6e/v7x)
    xpad = x_ref.shape[0]
    hpad = stk_ref.shape[0] - xpad
    ids = ids_ref[...]                      # (S, TB) int32
    seq, tb = ids.shape

    # counts[k, b] = #{s : ids[b, s] == k}; values <= S so exact in bf16.
    hol_iota = lax.broadcasted_iota(jnp.int32, (hpad, tb), 0)
    counts = (hol_iota == ids[0:1, :]).astype(edt)
    for s in range(1, seq):                 # S is small and static
        counts = counts + (hol_iota == ids[s:s + 1, :]).astype(edt)

    # Stage the stacked layer-1 RHS: rows [0:hpad) = counts, rows [hpad:) = x.
    # Both slab stores start on native tile boundaries (0 and 32 rows).
    stk_ref[0:hpad, :] = counts.astype(dt)
    stk_ref[hpad:, :] = x_ref[...].astype(dt)

    # Layer 1: ONE K=40 matmul (embedding mean already folded into w1s).
    h1 = jnp.dot(w1s_ref[...], stk_ref[...], preferred_element_type=jnp.float32)
    h1 = jnp.maximum(h1.astype(edt) + b1_ref[...], 0).astype(dt)       # (256, TB)
    h2 = jnp.dot(w2_ref[...], h1, preferred_element_type=jnp.float32)
    h2 = jnp.maximum(h2.astype(edt) + b2_ref[...], 0).astype(dt)       # (64, TB)
    h3 = jnp.dot(w3_ref[...], h2, preferred_element_type=jnp.float32)
    h3 = jnp.maximum(h3.astype(edt) + b3_ref[...], 0).astype(dt)       # (32, TB)
    # TODO(synk): nn.Dropout treated as eval-mode identity; training-mode
    # masking would require pltpu.prng_seed / pltpu.prng_random_bits.
    out = jnp.dot(w4_ref[...], h3, preferred_element_type=jnp.float32)
    out_ref[...] = (out + b4_ref[...]).astype(out_ref.dtype)           # (1, TB)


def _has_bf16_vpu():
    """v6e / v7x have a native bf16 VPU path; v5e does not."""
    try:
        kind = jax.devices()[0].device_kind.lower()
        return "v5" not in kind
    except Exception:
        return True


def nn_model_forward(x, holiday_id, params, *, tile_b=2048, use_bf16=True,
                     elemwise_bf16=None):
    """Fused forward: x (B, 6) f32, holiday_id (B, S) int32 -> (B, 1) f32."""
    batch, in_dim = x.shape
    seq = holiday_id.shape[1]
    assert in_dim == INPUT_DIM

    wdt = jnp.bfloat16 if use_bf16 else jnp.float32
    if elemwise_bf16 is None:
        elemwise_bf16 = use_bf16 and _has_bf16_vpu()
    edt = jnp.bfloat16 if (use_bf16 and elemwise_bf16) else jnp.float32

    # --- tile / grid selection: batch on the lane axis ------------------------
    if batch < 128:
        tile = batch                                    # single whole-batch tile
    else:
        p128 = _round_up(batch, 128)
        tile = min(_round_up(tile_b, 128), p128)
        if p128 >= 256:                                 # keep >= 2 grid steps so
            tile = min(tile, _round_up(p128 // 2, 128)) # both v7x TCs get work
    padded = _round_up(batch, tile)
    grid = (padded // tile,)

    # --- feature-major, padded inputs -----------------------------------------
    x_t = jnp.asarray(x, jnp.float32).T.astype(wdt)                   # (6, B)
    x_t = jnp.pad(x_t, ((0, XPAD - in_dim), (0, padded - batch)))     # (8, padded)
    ids_t = jnp.pad(jnp.asarray(holiday_id, jnp.int32).T,
                    ((0, 0), (0, padded - batch)))                    # (S, padded)

    # --- fold embedding mean into layer 1 and stack with the dense weights ----
    w1 = jnp.asarray(params["w1"], jnp.float32)                       # (256, 14)
    emb = jnp.asarray(params["emb"], jnp.float32)                     # (30, 8)
    w1h_emb = (w1[:, in_dim:] @ emb.T) / seq                          # (256, 30) f32
    w1s = jnp.zeros((A, KSTACK), jnp.float32)
    w1s = w1s.at[:, :NUM_HOL].set(w1h_emb)                            # hol cols
    w1s = w1s.at[:, HPAD:HPAD + in_dim].set(w1[:, :in_dim])           # dense cols
    w1s = w1s.astype(wdt)

    w2 = params["w2"].astype(wdt)                                     # (64, 256)
    w3 = params["w3"].astype(wdt)                                     # (32, 64)
    w4 = params["w4"].astype(wdt)                                     # (1, 32)
    b1 = params["b1"].astype(edt)                                     # (256, 1)
    b2 = params["b2"].astype(edt)                                     # (64, 1)
    b3 = params["b3"].astype(edt)                                     # (32, 1)
    b4 = params["b4"].astype(jnp.float32)                             # (1, 1)

    def batch_spec(shape):
        return pl.BlockSpec(shape, lambda i: (0, i))

    def const_spec(shape):
        return pl.BlockSpec(shape, lambda i: (0, 0))

    itemsize = 2 if use_bf16 else 4
    weight_bytes = (w1s.size + w2.size + w3.size + w4.size) * itemsize
    flops = 2 * padded * (A * KSTACK + B_ * A + C_ * B_ + OUTPUT_DIM * C_)
    bytes_accessed = (x_t.size * itemsize + ids_t.size * 4
                      + padded * OUTPUT_DIM * 4 + weight_bytes)

    out_t = pl.pallas_call(
        nn_model_kernel,
        out_shape=jax.ShapeDtypeStruct((OUTPUT_DIM, padded), jnp.float32),
        grid=grid,
        in_specs=[
            batch_spec((XPAD, tile)),                   # x (streamed)
            batch_spec((seq, tile)),                    # holiday ids (streamed)
            const_spec(w1s.shape), const_spec(b1.shape),
            const_spec(w2.shape), const_spec(b2.shape),
            const_spec(w3.shape), const_spec(b3.shape),
            const_spec(w4.shape), const_spec(b4.shape),
        ],
        out_specs=batch_spec((OUTPUT_DIM, tile)),       # lane-dense output
        scratch_shapes=[pltpu.VMEM((KSTACK, tile), wdt)],
        compiler_params=pltpu.CompilerParams(
            dimension_semantics=("parallel",),
            vmem_limit_bytes=32 * 1024 * 1024),
        cost_estimate=pl.CostEstimate(
            flops=flops, transcendentals=0, bytes_accessed=bytes_accessed),
    )(x_t, ids_t, w1s, b1, w2, b2, w3, b3, w4, b4)

    return out_t[:, :batch].T                           # (B, 1)


def init_params(key):
    """PyTorch-style init: Embedding ~ N(0,1); Linear W,b ~ U(+-1/sqrt(fan_in)).
    Weights stored in torch layout (out, in); biases stored as (out, 1)."""
    ks = jax.random.split(key, 9)

    def lin(kw, kb, fan_in, fan_out):
        bound = 1.0 / (fan_in ** 0.5)
        w = jax.random.uniform(kw, (fan_out, fan_in), jnp.float32, -bound, bound)
        b = jax.random.uniform(kb, (fan_out, 1), jnp.float32, -bound, bound)
        return w, b

    emb = jax.random.normal(ks[0], (NUM_HOL, EMBED_DIM), jnp.float32)
    w1, b1 = lin(ks[1], ks[2], INPUT_DIM + EMBED_DIM, A)
    w2, b2 = lin(ks[3], ks[4], A, B_)
    w3, b3 = lin(ks[5], ks[6], B_, C_)
    w4, b4 = lin(ks[7], ks[8], C_, OUTPUT_DIM)
    return {"emb": emb, "w1": w1, "b1": b1, "w2": w2, "b2": b2,
            "w3": w3, "b3": b3, "w4": w4, "b4": b4}


def reference_forward(x, holiday_id, params):
    """Pure-JAX reference matching the PyTorch module (dropout = eval mode)."""
    hol = params["emb"][holiday_id].mean(axis=1)            # (B, 8)
    h = jnp.concatenate([x, hol], axis=1)                   # (B, 14)
    h = jax.nn.relu(h @ params["w1"].T + params["b1"][:, 0])
    h = jax.nn.relu(h @ params["w2"].T + params["b2"][:, 0])
    h = jax.nn.relu(h @ params["w3"].T + params["b3"][:, 0])
    return h @ params["w4"].T + params["b4"][:, 0]          # (B, 1)


if __name__ == "__main__":
    key = jax.random.PRNGKey(0)
    k_params, k_x, k_ids, k_x2, k_ids2 = jax.random.split(key, 5)

    params = init_params(k_params)

    # Small single-tile case.
    batch, seq = 8, 3
    x = jax.random.normal(k_x, (batch, INPUT_DIM), jnp.float32)
    holiday_id = jax.random.randint(k_ids, (batch, seq), 0, NUM_HOL,
                                    dtype=jnp.int32)

    out = nn_model_forward(x, holiday_id, params)            # bf16-MXU path
    jax.block_until_ready(out)
    assert out.shape == (batch, OUTPUT_DIM)

    ref = reference_forward(x, holiday_id, params)
    out_f32 = nn_model_forward(x, holiday_id, params, use_bf16=False)
    assert jnp.allclose(out_f32, ref, atol=1e-4, rtol=1e-4), "f32 path mismatch"
    assert jnp.allclose(out, ref, atol=6e-2, rtol=6e-2), "bf16 path mismatch"

    # Multi-tile case (exercises grid > 1, batch padding, exact-math path).
    batch2 = 300
    x2 = jax.random.normal(k_x2, (batch2, INPUT_DIM), jnp.float32)
    ids2 = jax.random.randint(k_ids2, (batch2, seq), 0, NUM_HOL, dtype=jnp.int32)
    out2 = nn_model_forward(x2, ids2, params, use_bf16=False)
    jax.block_until_ready(out2)
    ref2 = reference_forward(x2, ids2, params)
    assert out2.shape == (batch2, OUTPUT_DIM)
    assert jnp.allclose(out2, ref2, atol=1e-4, rtol=1e-4), "tiled path mismatch"

    print("KERNEL_OK")
</pallas_src>

<mosaic_0001>
module attributes {stable_mosaic.version = 11 : i64} {
  func.func @nn_model_kernel(%arg0: i32, %arg1: memref<8x8xbf16, #tpu.memory_space<vmem>>, %arg2: memref<3x8xi32, #tpu.memory_space<vmem>>, %arg3: memref<256x40xbf16, #tpu.memory_space<vmem>>, %arg4: memref<256x1xbf16, #tpu.memory_space<vmem>>, %arg5: memref<64x256xbf16, #tpu.memory_space<vmem>>, %arg6: memref<64x1xbf16, #tpu.memory_space<vmem>>, %arg7: memref<32x64xbf16, #tpu.memory_space<vmem>>, %arg8: memref<32x1xbf16, #tpu.memory_space<vmem>>, %arg9: memref<1x32xbf16, #tpu.memory_space<vmem>>, %arg10: memref<1x1xf32, #tpu.memory_space<vmem>>, %arg11: memref<1x8xf32, #tpu.memory_space<vmem>>, %arg12: memref<40x8xbf16, #tpu.memory_space<vmem>>) attributes {dimension_semantics = [#tpu.dimension_semantics<parallel>], iteration_bounds = array<i64: 1>, scalar_prefetch = 0 : i64, scratch_operands = 1 : i64, tpu.core_type = #tpu.core_type<tc>, window_params = [{transform_indices = @transform_0, window_bounds = array<i64: 8, 8>}, {transform_indices = @transform_1, window_bounds = array<i64: 3, 8>}, {pipeline_mode = #tpu.pipeline_mode<synchronous>, transform_indices = @transform_2, window_bounds = array<i64: 256, 40>}, {pipeline_mode = #tpu.pipeline_mode<synchronous>, transform_indices = @transform_3, window_bounds = array<i64: 256, 1>}, {pipeline_mode = #tpu.pipeline_mode<synchronous>, transform_indices = @transform_4, window_bounds = array<i64: 64, 256>}, {pipeline_mode = #tpu.pipeline_mode<synchronous>, transform_indices = @transform_5, window_bounds = array<i64: 64, 1>}, {pipeline_mode = #tpu.pipeline_mode<synchronous>, transform_indices = @transform_6, window_bounds = array<i64: 32, 64>}, {pipeline_mode = #tpu.pipeline_mode<synchronous>, transform_indices = @transform_7, window_bounds = array<i64: 32, 1>}, {pipeline_mode = #tpu.pipeline_mode<synchronous>, transform_indices = @transform_8, window_bounds = array<i64: 1, 32>}, {pipeline_mode = #tpu.pipeline_mode<synchronous>, transform_indices = @transform_9, window_bounds = array<i64: 1, 1>}, {transform_indices = @transform_10, window_bounds = array<i64: 1, 8>}]} {
    %c0 = arith.constant 0 : index
    %c0_0 = arith.constant 0 : index
    %0 = vector.load %arg2[%c0, %c0_0] : memref<3x8xi32, #tpu.memory_space<vmem>>, vector<3x8xi32>
    %1 = tpu.iota {dimensions = array<i32: 0>} : vector<32x8xi32>
    %2 = vector.extract_strided_slice %0 {offsets = [0, 0], sizes = [1, 8], strides = [1, 1]} : vector<3x8xi32> to vector<1x8xi32>
    %3 = vector.broadcast %2 : vector<1x8xi32> to vector<32x8xi32>
    %4 = arith.cmpi eq, %1, %3 : vector<32x8xi32>
    %5 = arith.extui %4 : vector<32x8xi1> to vector<32x8xi32>
    %6 = arith.sitofp %5 : vector<32x8xi32> to vector<32x8xf32>
    %7 = arith.truncf %6 : vector<32x8xf32> to vector<32x8xbf16>
    %8 = vector.extract_strided_slice %0 {offsets = [1, 0], sizes = [1, 8], strides = [1, 1]} : vector<3x8xi32> to vector<1x8xi32>
    %9 = vector.broadcast %8 : vector<1x8xi32> to vector<32x8xi32>
    %10 = arith.cmpi eq, %1, %9 : vector<32x8xi32>
    %11 = arith.extui %10 : vector<32x8xi1> to vector<32x8xi32>
    %12 = arith.sitofp %11 : vector<32x8xi32> to vector<32x8xf32>
    %13 = arith.truncf %12 : vector<32x8xf32> to vector<32x8xbf16>
    %14 = arith.addf %7, %13 : vector<32x8xbf16>
    %15 = vector.extract_strided_slice %0 {offsets = [2, 0], sizes = [1, 8], strides = [1, 1]} : vector<3x8xi32> to vector<1x8xi32>
    %16 = vector.broadcast %15 : vector<1x8xi32> to vector<32x8xi32>
    %17 = arith.cmpi eq, %1, %16 : vector<32x8xi32>
    %18 = arith.extui %17 : vector<32x8xi1> to vector<32x8xi32>
    %19 = arith.sitofp %18 : vector<32x8xi32> to vector<32x8xf32>
    %20 = arith.truncf %19 : vector<32x8xf32> to vector<32x8xbf16>
    %21 = arith.addf %14, %20 : vector<32x8xbf16>
    %c0_1 = arith.constant 0 : index
    %c0_2 = arith.constant 0 : index
    %22 = vector.load %arg12[%c0_1, %c0_2] : memref<40x8xbf16, #tpu.memory_space<vmem>>, vector<32x8xbf16>
    tpu.vector_store %arg12[%c0_1, %c0_2], %21 {strides = array<i32>} : memref<40x8xbf16, #tpu.memory_space<vmem>>, vector<32x8xbf16>,
    %c0_3 = arith.constant 0 : index
    %c0_4 = arith.constant 0 : index
    %23 = vector.load %arg1[%c0_3, %c0_4] : memref<8x8xbf16, #tpu.memory_space<vmem>>, vector<8x8xbf16>
    %c32 = arith.constant 32 : index
    %c0_5 = arith.constant 0 : index
    %24 = vector.load %arg12[%c32, %c0_5] : memref<40x8xbf16, #tpu.memory_space<vmem>>, vector<8x8xbf16>
    tpu.vector_store %arg12[%c32, %c0_5], %23 {strides = array<i32>} : memref<40x8xbf16, #tpu.memory_space<vmem>>, vector<8x8xbf16>,
    %c0_6 = arith.constant 0 : index
    %c0_7 = arith.constant 0 : index
    %25 = vector.load %arg3[%c0_6, %c0_7] : memref<256x40xbf16, #tpu.memory_space<vmem>>, vector<256x40xbf16>
    %c0_8 = arith.constant 0 : index
    %c0_9 = arith.constant 0 : index
    %26 = vector.load %arg12[%c0_8, %c0_9] : memref<40x8xbf16, #tpu.memory_space<vmem>>, vector<40x8xbf16>
    %cst = arith.constant dense<0.000000e+00> : vector<256x8xf32>
    %27 = tpu.matmul %25, %26, %cst {dimension_numbers = #tpu.dot_dimension_numbers<[1], [0], [0], [1], [0, 0, 1, 1], [], []>} : vector<256x40xbf16>, vector<40x8xbf16>, vector<256x8xf32> -> vector<256x8xf32>
    %28 = arith.truncf %27 : vector<256x8xf32> to vector<256x8xbf16>
    %c0_10 = arith.constant 0 : index
    %c0_11 = arith.constant 0 : index
    %29 = vector.load %arg4[%c0_10, %c0_11] : memref<256x1xbf16, #tpu.memory_space<vmem>>, vector<256x1xbf16>
    %30 = vector.broadcast %29 : vector<256x1xbf16> to vector<256x8xbf16>
    %31 = arith.addf %28, %30 : vector<256x8xbf16>
    %cst_12 = arith.constant 0.000000e+00 : bf16
    %32 = vector.broadcast %cst_12 : bf16 to vector<256x8xbf16>
    %33 = arith.maximumf %31, %32 : vector<256x8xbf16>
    %c0_13 = arith.constant 0 : index
    %c0_14 = arith.constant 0 : index
    %34 = vector.load %arg5[%c0_13, %c0_14] : memref<64x256xbf16, #tpu.memory_space<vmem>>, vector<64x256xbf16>
    %cst_15 = arith.constant dense<0.000000e+00> : vector<64x8xf32>
    %35 = tpu.matmul %34, %33, %cst_15 {dimension_numbers = #tpu.dot_dimension_numbers<[1], [0], [0], [1], [0, 0, 1, 1], [], []>} : vector<64x256xbf16>, vector<256x8xbf16>, vector<64x8xf32> -> vector<64x8xf32>
    %36 = arith.truncf %35 : vector<64x8xf32> to vector<64x8xbf16>
    %c0_16 = arith.constant 0 : index
    %c0_17 = arith.constant 0 : index
    %37 = vector.load %arg6[%c0_16, %c0_17] : memref<64x1xbf16, #tpu.memory_space<vmem>>, vector<64x1xbf16>
    %38 = vector.broadcast %37 : vector<64x1xbf16> to vector<64x8xbf16>
    %39 = arith.addf %36, %38 : vector<64x8xbf16>
    %cst_18 = arith.constant 0.000000e+00 : bf16
    %40 = vector.broadcast %cst_18 : bf16 to vector<64x8xbf16>
    %41 = arith.maximumf %39, %40 : vector<64x8xbf16>
    %c0_19 = arith.constant 0 : index
    %c0_20 = arith.constant 0 : index
    %42 = vector.load %arg7[%c0_19, %c0_20] : memref<32x64xbf16, #tpu.memory_space<vmem>>, vector<32x64xbf16>
    %cst_21 = arith.constant dense<0.000000e+00> : vector<32x8xf32>
    %43 = tpu.matmul %42, %41, %cst_21 {dimension_numbers = #tpu.dot_dimension_numbers<[1], [0], [0], [1], [0, 0, 1, 1], [], []>} : vector<32x64xbf16>, vector<64x8xbf16>, vector<32x8xf32> -> vector<32x8xf32>
    %44 = arith.truncf %43 : vector<32x8xf32> to vector<32x8xbf16>
    %c0_22 = arith.constant 0 : index
    %c0_23 = arith.constant 0 : index
    %45 = vector.load %arg8[%c0_22, %c0_23] : memref<32x1xbf16, #tpu.memory_space<vmem>>, vector<32x1xbf16>
    %46 = vector.broadcast %45 : vector<32x1xbf16> to vector<32x8xbf16>
    %47 = arith.addf %44, %46 : vector<32x8xbf16>
    %cst_24 = arith.constant 0.000000e+00 : bf16
    %48 = vector.broadcast %cst_24 : bf16 to vector<32x8xbf16>
    %49 = arith.maximumf %47, %48 : vector<32x8xbf16>
    %c0_25 = arith.constant 0 : index
    %c0_26 = arith.constant 0 : index
    %50 = vector.load %arg9[%c0_25, %c0_26] : memref<1x32xbf16, #tpu.memory_space<vmem>>, vector<1x32xbf16>
    %cst_27 = arith.constant dense<0.000000e+00> : vector<1x8xf32>
    %51 = tpu.matmul %50, %49, %cst_27 {dimension_numbers = #tpu.dot_dimension_numbers<[1], [0], [0], [1], [0, 0, 1, 1], [], []>} : vector<1x32xbf16>, vector<32x8xbf16>, vector<1x8xf32> -> vector<1x8xf32>
    %c0_28 = arith.constant 0 : index
    %c0_29 = arith.constant 0 : index
    %52 = vector.load %arg10[%c0_28, %c0_29] : memref<1x1xf32, #tpu.memory_space<vmem>>, vector<1x1xf32>
    %53 = vector.broadcast %52 : vector<1x1xf32> to vector<1x8xf32>
    %54 = arith.addf %51, %53 : vector<1x8xf32>
    %c0_30 = arith.constant 0 : index
    %c0_31 = arith.constant 0 : index
    %55 = vector.load %arg11[%c0_30, %c0_31] : memref<1x8xf32, #tpu.memory_space<vmem>>, vector<1x8xf32>
    tpu.vector_store %arg11[%c0_30, %c0_31], %54 {strides = array<i32>} : memref<1x8xf32, #tpu.memory_space<vmem>>, vector<1x8xf32>,
    return
  }
  func.func @transform_0(%arg0: i32) -> (i32, i32) {
    %c0_i32 = arith.constant 0 : i32
    %c0_i32_0 = arith.constant 0 : i32
    return %c0_i32, %arg0 : i32, i32
  }
  func.func @transform_1(%arg0: i32) -> (i32, i32) {
    %c0_i32 = arith.constant 0 : i32
    %c0_i32_0 = arith.constant 0 : i32
    return %c0_i32, %arg0 : i32, i32
  }
  func.func @transform_2(%arg0: i32) -> (i32, i32) {
    %c0_i32 = arith.constant 0 : i32
    %c0_i32_0 = arith.constant 0 : i32
    %c0_i32_1 = arith.constant 0 : i32
    return %c0_i32, %c0_i32_0 : i32, i32
  }
  func.func @transform_3(%arg0: i32) -> (i32, i32) {
    %c0_i32 = arith.constant 0 : i32
    %c0_i32_0 = arith.constant 0 : i32
    %c0_i32_1 = arith.constant 0 : i32
    return %c0_i32, %c0_i32_0 : i32, i32
  }
  func.func @transform_4(%arg0: i32) -> (i32, i32) {
    %c0_i32 = arith.constant 0 : i32
    %c0_i32_0 = arith.constant 0 : i32
    %c0_i32_1 = arith.constant 0 : i32
    return %c0_i32, %c0_i32_0 : i32, i32
  }
  func.func @transform_5(%arg0: i32) -> (i32, i32) {
    %c0_i32 = arith.constant 0 : i32
    %c0_i32_0 = arith.constant 0 : i32
    %c0_i32_1 = arith.constant 0 : i32
    return %c0_i32, %c0_i32_0 : i32, i32
  }
  func.func @transform_6(%arg0: i32) -> (i32, i32) {
    %c0_i32 = arith.constant 0 : i32
    %c0_i32_0 = arith.constant 0 : i32
    %c0_i32_1 = arith.constant 0 : i32
    return %c0_i32, %c0_i32_0 : i32, i32
  }
  func.func @transform_7(%arg0: i32) -> (i32, i32) {
    %c0_i32 = arith.constant 0 : i32
    %c0_i32_0 = arith.constant 0 : i32
    %c0_i32_1 = arith.constant 0 : i32
    return %c0_i32, %c0_i32_0 : i32, i32
  }
  func.func @transform_8(%arg0: i32) -> (i32, i32) {
    %c0_i32 = arith.constant 0 : i32
    %c0_i32_0 = arith.constant 0 : i32
    %c0_i32_1 = arith.constant 0 : i32
    return %c0_i32, %c0_i32_0 : i32, i32
  }
  func.func @transform_9(%arg0: i32) -> (i32, i32) {
    %c0_i32 = arith.constant 0 : i32
    %c0_i32_0 = arith.constant 0 : i32
    %c0_i32_1 = arith.constant 0 : i32
    return %c0_i32, %c0_i32_0 : i32, i32
  }
  func.func @transform_10(%arg0: i32) -> (i32, i32) {
    %c0_i32 = arith.constant 0 : i32
    %c0_i32_0 = arith.constant 0 : i32
    return %c0_i32, %arg0 : i32, i32
  }
}

</mosaic_0001>

<bundles_post_ra>
// kernel: tpu_custom_call.1
= control target key start
LH: loop header
LB: loop body
LE: loop exit
PB: predicated region body
PF: predicated region fallthrough
CT: control target
= control target key end

     0   :  { %s2339_s0 = inlined_call_operand.vmem [shape: bf16[8,8], index: 0, kind: input, shape index: {}]   ;;  %s2340_s1 = inlined_call_operand.vmem [shape: s32[3,8], index: 1, kind: input, shape index: {}]   ;;  %s2341_s2 = inlined_call_operand.vmem [shape: bf16[256,40], index: 2, kind: input, shape index: {}]   ;;  %s2342_s3 = inlined_call_operand.vmem [shape: bf16[256,1], index: 3, kind: input, shape index: {}]   ;;  %s2343_s4 = inlined_call_operand.vmem [shape: bf16[64,256], index: 4, kind: input, shape index: {}]   ;;  %s2344_s5 = inlined_call_operand.vmem [shape: bf16[64,1], index: 5, kind: input, shape index: {}]   ;;  %s2345_s6 = inlined_call_operand.vmem [shape: bf16[32,64], index: 6, kind: input, shape index: {}]   ;;  %s2346_s7 = inlined_call_operand.vmem [shape: bf16[32,1], index: 7, kind: input, shape index: {}]   ;;  %s2347_s8 = inlined_call_operand.vmem [shape: bf16[1,32], index: 8, kind: input, shape index: {}]   ;;  %s2348_s9 = inlined_call_operand.<no memory space> [shape: f32[1,1], index: 9, kind: input, shape index: {}]   ;;  %s2349_s10 = inlined_call_operand.hbm [shape: f32[1,8], index: 10, kind: output, shape index: {}]  }
   0x1   :  { %v15_v0 = vstv %s2348_s9 }
   0x2   :  { %16 = vst [vmem:[#allocation3] sm:$0x1] %v15_v0 }
   0x3   :  { %vm117_vm0 = vcmask 60416   ;;  %v122_v1 = vld [vmem:[%s2339_s0] sm:$0xf]  ;;  %v40_v2 = vlaneseq  ;;  %vm256_vm1 = vcmask 326656   ;;  %v2353_v10 = vmov 0   ;;  %v1718_v62 = vld [vmem:[%s2341_s2 + $0x8] sm:$0xff]  }
   0x4   :  { %123 = vst.msk [vmem:[#allocation2 + $0x10] sm:$0xf] %vm117_vm0, %v122_v1  ;;  %v39_v3 = vld [vmem:[%s2340_s1] sm:$0x7]  ;;  %1712 = vset.pattern.permute.xlu0 %v2353_v10  ;;  %1713 = vset.pattern.permute.xlu1 %v2353_v10  ;;  %vm305_vm2 = vcmask 1043456   ;;  %v2351_v20 = vmov 0.0  }
   0x5   :  { %v1717_v4 = vld [vmem:[%s2341_s2] sm:$0xff]   ;;  %v1842_v5 = vshrl.u32 %v40_v2, 7  ;;  %v516_v13 = vld [vmem:[%s2342_s3 + $0x78] sm:$0xf]  ;;  %v517_v16 = vld [vmem:[%s2342_s3 + $0x7c] sm:$0xf] }
   0x6   :  { %1654 = vmatprep.mubr.msk.bf16.mxu0 %vm256_vm1, %v1717_v4  ;;  %880 = vperm.xlu0 %1712, %v516_v13   ;;  %v500_v18 = vld [vmem:[%s2342_s3 + $0x38] sm:$0xf]  ;;  %v501_v28 = vld [vmem:[%s2342_s3 + $0x3c] sm:$0xf]  ;;  %v514_v30 = vld [vmem:[%s2342_s3 + $0x70] sm:$0xf] }
   0x7   :  { %2359 = vst [vmem:[#allocation7_spill] sm:$0xff] %v1842_v5  ;;  %v43_v6 = vadd.s32 16, %v1842_v5  ;;  %v44_v7 = vadd.s32 24, %v1842_v5  ;;  %v2350_v8 = vsub.s32 0, %v1842_v5  ;;  %v65_v9 = vsub.s32 1, %v1842_v5  ;;  %688 = vperm.xlu1 %1713, %v500_v18   ;;  %v1719_v63 = vld [vmem:[%s2341_s2 + $0x10] sm:$0xff]  }
   0x8   :  { %v85_v11 = vsub.s32 2, %v1842_v5  ;;  %v42_v12 = vadd.s32 8, %v1842_v5  ;;  %v515_v37 = vld [vmem:[%s2342_s3 + $0x74] sm:$0xf]  ;;  %v498_v44 = vld [vmem:[%s2342_s3 + $0x30] sm:$0xf] }
   0x9   :  { %v48_v14 = vrot.slane %v39_v3, %v2350_v8  ;;  %v66_v15 = vrot.slane %v39_v3, %v65_v9  ;;  %v499_v49 = vld [vmem:[%s2342_s3 + $0x34] sm:$0xf]  ;;  %v512_v51 = vld [vmem:[%s2342_s3 + $0x68] sm:$0xf]  ;;  %v513_v54 = vld [vmem:[%s2342_s3 + $0x6c] sm:$0xf] }
   0xa   :  { %v86_v17 = vrot.slane %v39_v3, %v85_v11  ;;  %892 = vperm.xlu0 %1712, %v517_v16   ;;  %v496_v55 = vld [vmem:[%s2342_s3 + $0x28] sm:$0xf]  ;;  %v497_v56 = vld [vmem:[%s2342_s3 + $0x2c] sm:$0xf]  ;;  %v510_v58 = vld [vmem:[%s2342_s3 + $0x60] sm:$0xf] }
   0xb   :  { %v1714_v19 = vld [vmem:[#allocation2 + $0x10] ss:$0 sps:$4 sm:$0xff]   ;;  %vm51_vm3 = vcmp.eq.s32.totalorder %v43_v6, %v48_v14  ;;  %vm52_vm4 = vcmp.eq.s32.totalorder %v44_v7, %v48_v14  ;;  %vm69_vm5 = vcmp.eq.s32.totalorder %v43_v6, %v66_v15  ;;  %vm70_vm6 = vcmp.eq.s32.totalorder %v44_v7, %v66_v15  ;;  %700 = vperm.xlu1 %1713, %v501_v28   ;;  %v511_v59 = vld [vmem:[%s2342_s3 + $0x64] sm:$0xf]  ;;  %v494_v61 = vld [vmem:[%s2342_s3 + $0x20] sm:$0xf] }
   0xc   :  { %v1496_v21 = vsel %vm51_vm3, 1.0, %v2351_v20  ;;  %v1497_v22 = vsel %vm52_vm4, 1.0, %v2351_v20  ;;  %v1500_v23 = vsel %vm69_vm5, 1.0, %v2351_v20  ;;  %v1501_v24 = vsel %vm70_vm6, 1.0, %v2351_v20  ;;  %1706 = vmatprep.subr.msk.bf16.mxu0 %vm305_vm2, %v1714_v19  ;;  %v495_v0 = vld [vmem:[%s2342_s3 + $0x24] sm:$0xf] }
   0xd   :  { %v307_v25 = vsel %vm305_vm2, %v1714_v19, 0  ;;  %v62_v26 = vpack.c.bf16 %v1497_v22, %v1496_v21  ;;  %v80_v27 = vpack.c.bf16 %v1501_v24, %v1500_v23  ;;  %vm89_vm7 = vcmp.eq.s32.totalorder %v43_v6, %v86_v17  ;;  %v508_v1 = vld [vmem:[%s2342_s3 + $0x58] sm:$0xf]  ;;  %v509_v2 = vld [vmem:[%s2342_s3 + $0x5c] sm:$0xf]  ;;  %v1721_v6 = vld [vmem:[%s2341_s2 + $0x20] sm:$0xff]  }
   0xe   :  { %1649 = vmatpush3.bf16.msra.mxu0 %v307_v25  ;;  %vm90_vm8 = vcmp.eq.s32.totalorder %v44_v7, %v86_v17  ;;  %v1504_v29 = vsel %vm89_vm7, 1.0, %v2351_v20  ;;  %vm49_vm9 = vcmp.eq.s32.totalorder %v1842_v5, %v48_v14  ;;  %vm50_vm10 = vcmp.eq.s32.totalorder %v42_v12, %v48_v14  ;;  %856 = vperm.xlu0 %1712, %v514_v30   ;;  %v492_v3 = vld [vmem:[%s2342_s3 + $0x18] sm:$0xf]  ;;  %v493_v7 = vld [vmem:[%s2342_s3 + $0x1c] sm:$0xf] }
   0xf   :  { %v82_v31 = vadd.bf16 %v80_v27, %v62_v26  ;;  %v1505_v32 = vsel %vm90_vm8, 1.0, %v2351_v20  ;;  %v1494_v33 = vsel %vm49_vm9, 1.0, %v2351_v20  ;;  %v1495_v34 = vsel %vm50_vm10, 1.0, %v2351_v20  ;;  %868 = vperm.xlu1 %1713, %v515_v37   ;;  %v1720_v4 = vld [vmem:[%s2341_s2 + $0x18] sm:$0xff]  }
  0x10   :  { %v100_v35 = vpack.c.bf16 %v1505_v32, %v1504_v29  ;;  %v61_v36 = vpack.c.bf16 %v1495_v34, %v1494_v33  ;;  %vm67_vm11 = vcmp.eq.s32.totalorder %v1842_v5, %v66_v15  ;;  %vm68_vm12 = vcmp.eq.s32.totalorder %v42_v12, %v66_v15 }
  0x11   :  { %v1498_v38 = vsel %vm67_vm11, 1.0, %v2351_v20  ;;  %v1499_v39 = vsel %vm68_vm12, 1.0, %v2351_v20  ;;  %vm87_vm13 = vcmp.eq.s32.totalorder %v1842_v5, %v86_v17  ;;  %vm88_vm14 = vcmp.eq.s32.totalorder %v42_v12, %v86_v17 }
  0x12   :  { %v102_v40 = vadd.bf16 %v100_v35, %v82_v31  ;;  %v79_v41 = vpack.c.bf16 %v1499_v39, %v1498_v38  ;;  %v1502_v42 = vsel %vm87_vm13, 1.0, %v2351_v20  ;;  %v1503_v43 = vsel %vm88_vm14, 1.0, %v2351_v20  ;;  %664 = vperm.xlu0 %1712, %v498_v44  }
  0x13   :  { %v99_v45 = vpack.c.bf16 %v1503_v43, %v1502_v42  ;;  %676 = vperm.xlu1 %1713, %v499_v49  }
  0x14   :  { %v1508_v46 = vcombine.low %v102_v40, %v102_v40  ;;  %v1509_v47 = vcombine.high %v102_v40, %v102_v40  ;;  %v81_v48 = vadd.bf16 %v79_v41, %v61_v36 }
  0x16   :  { %120 = vst.msk [vmem:[#allocation2 + $0x8] sm:$0xf] %vm117_vm0, %v1508_v46  ;;  %121 = vst.msk [vmem:[#allocation2 + $0xc] sm:$0xf] %vm117_vm0, %v1509_v47  ;;  %v101_v50 = vadd.bf16 %v99_v45, %v81_v48  ;;  %832 = vperm.xlu0 %1712, %v512_v51  }
  0x17   :  { %844 = vperm.xlu1 %1713, %v513_v54  }
  0x18   :  { %v1506_v52 = vcombine.low %v101_v50, %v101_v50  ;;  %v1507_v53 = vcombine.high %v101_v50, %v101_v50 }
  0x1a   :  { %118 = vst.msk [vmem:[#allocation2] sm:$0xf] %vm117_vm0, %v1506_v52  ;;  %119 = vst.msk [vmem:[#allocation2 + $0x4] sm:$0xf] %vm117_vm0, %v1507_v53  ;;  %640 = vperm.xlu0 %1712, %v496_v55  }
  0x1b   :  { %652 = vperm.xlu1 %1713, %v497_v56  }
  0x1d   :  { %v1715_v57 = vld [vmem:[#allocation2 + $0x8] sm:$0xff]  }
  0x1e   :  { %1650 = vmatprep.subr.bf16.mxu0 %v1715_v57  ;;  %808 = vperm.xlu0 %1712, %v510_v58  }
  0x1f   :  { %1651 = vmatpush3.bf16.msra.mxu0 %v1715_v57  ;;  %820 = vperm.xlu1 %1713, %v511_v59  }
  0x21   :  { %v1716_v60 = vld [vmem:[#allocation2] sm:$0xff]  }
  0x22   :  { %1652 = vmatprep.subr.bf16.mxu0 %v1716_v60  ;;  %616 = vperm.xlu0 %1712, %v494_v61  }
  0x23   :  { %1653 = vmatpush3.bf16.msra.mxu0 %v1716_v60  ;;  %628 = vperm.xlu1 %1713, %v495_v0  }
  0x26   :  { %1655 = vmatmul.mubr.msk.bf16.vlgmr.msra.gmra.mxu0 %vm256_vm1, %v1718_v62  ;;  %784 = vperm.xlu0 %1712, %v508_v1  }
  0x27   :  { %1658 = vmatprep.mubr.msk.bf16.mxu0 %vm256_vm1, %v1719_v63  ;;  %796 = vperm.xlu1 %1713, %v509_v2  }
  0x28   :  { %17 = vsyncpa [#allocation5], 0  ;;  %v506_v9 = vld [vmem:[%s2342_s3 + $0x50] sm:$0xf]  ;;  %v507_v11 = vld [vmem:[%s2342_s3 + $0x54] sm:$0xf] }
  0x29   :  { %v490_v12 = vld [vmem:[%s2342_s3 + $0x10] sm:$0xf]  ;;  %v1722_v13 = vld [vmem:[%s2341_s2 + $0x28] sm:$0xff]   ;;  %v491_v15 = vld [vmem:[%s2342_s3 + $0x14] sm:$0xf]  ;;  %vm1297_vm15 = vcmask 523264  }
  0x2a   :  { %592 = vperm.xlu0 %1712, %v492_v3   ;;  %v1723_v14 = vld [vmem:[%s2341_s2 + $0x30] sm:$0xff]   ;;  %v504_v16 = vld [vmem:[%s2342_s3 + $0x48] sm:$0xf]  ;;  %v505_v17 = vld [vmem:[%s2342_s3 + $0x4c] sm:$0xf]  ;;  %vm1772_vm0 = vmmov 0  }
  0x2b   :  { %604 = vperm.xlu1 %1713, %v493_v7   ;;  %v488_v18 = vld [vmem:[%s2342_s3 + $0x8] sm:$0xf]  ;;  %v1724_v19 = vld [vmem:[%s2341_s2 + $0x38] sm:$0xff]   ;;  %v1725_v21 = vld [vmem:[%s2341_s2 + $0x40] sm:$0xff]   ;;  %s1773_s16 = smov [#allocation4]   ;;  %vm1478_vm2 = vcmask 57344  }
  0x2c   :  { %v489_v22 = vld [vmem:[%s2342_s3 + $0xc] sm:$0xf]  ;;  %v502_v23 = vld [vmem:[%s2342_s3 + $0x40] sm:$0xf]  ;;  %v503_v24 = vld [vmem:[%s2342_s3 + $0x44] sm:$0xf] }
  0x2d   :  { %v486_v25 = vld [vmem:[%s2342_s3] sm:$0xf]  ;;  %v1726_v26 = vld [vmem:[%s2341_s2 + $0x48] sm:$0xff]   ;;  %v1727_v27 = vld [vmem:[%s2341_s2 + $0x50] sm:$0xff]   ;;  %s1486_s17 = sshll.u32 %s1773_s16, 4  ;;  %s1487_s17 = int_to_ptr.vmem [resolvable:$true] %s1486_s17 }
  0x2e   :  { %1659 = vmatmul.mubr.msk.bf16.gmra.mxu0 %vm256_vm1, %v1720_v4  ;;  %760 = vperm.xlu0 %1712, %v506_v9   ;;  %v487_v28 = vld [vmem:[%s2342_s3 + $0x4] sm:$0xf]  ;;  %v1153_v29 = vld [vmem:[%s2344_s5 + $0x18] sm:$0xf]  ;;  %v1154_v30 = vld [vmem:[%s2344_s5 + $0x1c] sm:$0xf]  ;;  %p1752_p1 = scmp.lt.s32.totalorder %s1487_s17, %s1487_s17 }
  0x2f   :  { %1662 = vmatprep.mubr.msk.bf16.mxu0 %vm256_vm1, %v1721_v6  ;;  %772 = vperm.xlu1 %1713, %v507_v11   ;;  %v1151_v31 = vld [vmem:[%s2344_s5 + $0x10] sm:$0xf]  ;;  %v1728_v32 = vld [vmem:[%s2341_s2 + $0x58] sm:$0xff]   ;;  %v1729_v33 = vld [vmem:[%s2341_s2 + $0x60] sm:$0xff]   ;;  %s1747_s18 = scalar_lea.vmem %s1487_s17, 16 }
  0x30   :  { %v1152_v34 = vld [vmem:[%s2344_s5 + $0x14] sm:$0xf]  ;;  %v1149_v35 = vld [vmem:[%s2344_s5 + $0x8] sm:$0xf]  ;;  %v1150_v36 = vld [vmem:[%s2344_s5 + $0xc] sm:$0xf]  ;;  %p1748_p0 = scmp.ne.s32.totalorder %s1487_s17, %s1747_s18 }
  0x31   :  { %v1147_v37 = vld [vmem:[%s2344_s5] sm:$0xf]  ;;  %v1730_v38 = vld [vmem:[%s2341_s2 + $0x68] sm:$0xff]   ;;  %v1731_v39 = vld [vmem:[%s2341_s2 + $0x70] sm:$0xff]  }
  0x32   :  { %568 = vperm.xlu0 %1712, %v490_v12   ;;  %v1148_v40 = vld [vmem:[%s2344_s5 + $0x4] sm:$0xf]  ;;  %v1357_v41 = vld [vmem:[%s2346_s7 + $0x8] sm:$0xf]  ;;  %v1358_v42 = vld [vmem:[%s2346_s7 + $0xc] sm:$0xf] }
  0x33   :  { %580 = vperm.xlu1 %1713, %v491_v15   ;;  %v1355_v43 = vld [vmem:[%s2346_s7] sm:$0xf]  ;;  %v1732_v44 = vld [vmem:[%s2341_s2 + $0x78] sm:$0xff]   ;;  %v1356_v45 = vld [vmem:[%s2346_s7 + $0x4] sm:$0xf]  ;;  %s1751_s5 = scalar_lea.vmem %s1487_s17, 32 }
  0x34   :  { %v1424_v46 = vld [vmem:[#allocation3] sm:$0x1]  ;;  %v1735_v47 = vld [vmem:[%s2343_s4 + $0x4] ss:$8 sps:$4 sm:$0xff]   ;;  %p1753_p2 = scmp.lt.s32.totalorder %s1751_s5, %s1747_s18 }
  0x35   :  { %1110 = vmatprep.mubr.bf16.mxu1 %v1735_v47 }
  0x36   :  { %1663 = vmatmul.mubr.msk.bf16.gmra.mxu0 %vm256_vm1, %v1722_v13  ;;  %736 = vperm.xlu0 %1712, %v504_v16   ;;  %p1754_p3 = por %p1753_p2, %p1752_p1 }
  0x37   :  { %1666 = vmatprep.mubr.msk.bf16.mxu0 %vm256_vm1, %v1723_v14  ;;  %748 = vperm.xlu1 %1713, %v505_v17  }
  0x38   :  { %p1755_p4 = pnand %p1754_p3, %p1748_p0 }
  0x3a   :  { %544 = vperm.xlu0 %1712, %v488_v18  }
  0x3b   :  { %556 = vperm.xlu1 %1713, %v489_v22  }
  0x3e   :  { %1667 = vmatmul.mubr.msk.bf16.gmra.mxu0 %vm256_vm1, %v1724_v19  ;;  %712 = vperm.xlu0 %1712, %v502_v23  }
  0x3f   :  { %1670 = vmatprep.mubr.msk.bf16.mxu0 %vm256_vm1, %v1725_v21  ;;  %724 = vperm.xlu1 %1713, %v503_v24  }
  0x42   :  { %520 = vperm.xlu0 %1712, %v486_v25  }
  0x43   :  { %532 = vperm.xlu1 %1713, %v487_v28  }
  0x46   :  { %1671 = vmatmul.mubr.msk.bf16.gmra.mxu0 %vm256_vm1, %v1726_v26  ;;  %1229 = vperm.xlu0 %1712, %v1153_v29  }
  0x47   :  { %1674 = vmatprep.mubr.msk.bf16.mxu0 %vm256_vm1, %v1727_v27  ;;  %1241 = vperm.xlu1 %1713, %v1154_v30  }
  0x4a   :  { %1205 = vperm.xlu0 %1712, %v1151_v31  }
  0x4b   :  { %1217 = vperm.xlu1 %1713, %v1152_v34  }
  0x4e   :  { %1675 = vmatmul.mubr.msk.bf16.gmra.mxu0 %vm256_vm1, %v1728_v32  ;;  %1181 = vperm.xlu0 %1712, %v1149_v35  }
  0x4f   :  { %1678 = vmatprep.mubr.msk.bf16.mxu0 %vm256_vm1, %v1729_v33  ;;  %1193 = vperm.xlu1 %1713, %v1150_v36   ;;  %v1771_v33 = vmov 839922192  }
  0x50   :  { %v524_v34 = vunpack.c.l.s4 %v1771_v33 }
  0x52   :  { %1157 = vperm.xlu0 %1712, %v1147_v37  }
  0x53   :  { %1169 = vperm.xlu1 %1713, %v1148_v40  }
  0x56   :  { %1679 = vmatmul.mubr.msk.bf16.gmra.mxu0 %vm256_vm1, %v1730_v38  ;;  %1385 = vperm.xlu0 %1712, %v1357_v41   ;;  %v525_v38 = vunpack.c.0.s8 %v524_v34 }
  0x57   :  { %1682 = vmatprep.mubr.msk.bf16.mxu0 %vm256_vm1, %v1731_v39  ;;  %1397 = vperm.xlu1 %1713, %v1358_v42  }
  0x5a   :  { %1361 = vperm.xlu0 %1712, %v1355_v43   ;;  %v2170_v43 = vsub.s32 %v525_v38, %v1842_v5 }
  0x5b   :  { %1373 = vperm.xlu1 %1713, %v1356_v45  }
  0x5e   :  { %1683 = vmatmul.mubr.msk.bf16.gmra.mxu0 %vm256_vm1, %v1732_v44  ;;  %1427 = vperm.xlu0 %1712, %v1424_v46   ;;  %vm1434_vm1 = vcmask 261120  }
  0x81   :  { %v2073_v49 = vpop.permute.xlu0 %880 }
  0x82   :  { %v2071_v48 = vpop.permute.xlu1 %688  ;;  %v889_v8 = vrot.slane %v2073_v49, %v2170_v43 }
  0x83   :  { %v697_v45 = vrot.slane %v2071_v48, %v2170_v43 }
  0x85   :  { %v2077_v51 = vpop.permute.xlu0 %892 }
  0x86   :  { %v2075_v50 = vpop.permute.xlu1 %700  ;;  %v901_v20 = vrot.slane %v2077_v51, %v2170_v43 }
  0x87   :  { %v709_v46 = vrot.slane %v2075_v50, %v2170_v43 }
  0x88   :  { %v1560_v10 = vcombine.low %v889_v8, %v901_v20 }
  0x89   :  { %v2085_v55 = vpop.permute.xlu0 %856  ;;  %v1552_v38 = vcombine.low %v697_v45, %v709_v46 }
  0x8a   :  { %v2081_v53 = vpop.permute.xlu1 %868  ;;  %v865_v2 = vrot.slane %v2085_v55, %v2170_v43 }
  0x8b   :  { %v877_v49 = vrot.slane %v2081_v53, %v2170_v43 }
  0x8d   :  { %v2099_v62 = vpop.permute.xlu0 %664 }
  0x8e   :  { %v2093_v59 = vpop.permute.xlu1 %676  ;;  %v673_v57 = vrot.slane %v2099_v62, %v2170_v43 }
  0x8f   :  { %v685_v48 = vrot.slane %v2093_v59, %v2170_v43 }
  0x91   :  { %v2111_v4 = vpop.permute.xlu0 %832 }
  0x92   :  { %v2105_v1 = vpop.permute.xlu1 %844  ;;  %v841_v51 = vrot.slane %v2111_v4, %v2170_v43 }
  0x93   :  { %v853_v45 = vrot.slane %v2105_v1, %v2170_v43 }
  0x95   :  { %v2123_v13 = vpop.permute.xlu0 %640 }
  0x96   :  { %v2119_v11 = vpop.permute.xlu1 %652  ;;  %v649_v62 = vrot.slane %v2123_v13, %v2170_v43 }
  0x97   :  { %v661_v59 = vrot.slane %v2119_v11, %v2170_v43 }
  0x99   :  { %v2131_v18 = vpop.permute.xlu0 %808 }
  0x9a   :  { %v2127_v16 = vpop.permute.xlu1 %820  ;;  %v817_v13 = vrot.slane %v2131_v18, %v2170_v43 }
  0x9b   :  { %v829_v11 = vrot.slane %v2127_v16, %v2170_v43 }
  0x9d   :  { %v2139_v24 = vpop.permute.xlu0 %616 }
  0x9e   :  { %v2135_v22 = vpop.permute.xlu1 %628 }
  0xa1   :  { %v2149_v29 = vpop.permute.xlu0 %784 }
  0xa2   :  { %v2145_v27 = vpop.permute.xlu1 %796 }
  0xa5   :  { %v2159_v36 = vpop.permute.xlu0 %592 }
  0xa6   :  { %v2155_v32 = vpop.permute.xlu1 %604 }
  0xa9   :  { %v2167_v42 = vpop.permute.xlu0 %760 }
  0xaa   :  { %v2163_v40 = vpop.permute.xlu1 %772 }
  0xad   :  { %v2182_v60 = vpop.permute.xlu0 %568 }
  0xae   :  { %v2176_v33 = vpop.permute.xlu1 %580 }
  0xe6   :  { %v2079_v52 = vpop.f32.mrf.mxu0 }
  0xe7   :  { %2360 = vst [vmem:[#allocation8_spill] sm:$0xff] %v2079_v52  ;;  %v1558_v52 = vcombine.low %v841_v51, %v853_v45 }
  0xe8   :  { %v2083_v54 = vpop.f32.mrf.mxu0 }
  0xe9   :  { %2361 = vst [vmem:[#allocation9_spill] sm:$0xff] %v2083_v54  ;;  %v1559_v54 = vcombine.low %v865_v2, %v877_v49  ;;  %v637_v2 = vrot.slane %v2135_v22, %v2170_v43  ;;  %v805_v22 = vrot.slane %v2145_v27, %v2170_v43 }
  0xea   :  { %v2087_v56 = vpop.f32.mrf.mxu0 }
  0xec   :  { %v2091_v58 = vpop.f32.mrf.mxu0 }
  0xed   :  { %2362 = vst [vmem:[#allocation10_spill] sm:$0xff] %v2091_v58  ;;  %v2204_v58 = vpop.permute.xlu0 %736 }
  0xee   :  { %v2097_v61 = vpop.f32.mrf.mxu0 }
  0xf0   :  { %v2101_v63 = vpop.f32.mrf.mxu0 }
  0xf2   :  { %v2103_v0 = vpop.f32.mrf.mxu0 }
  0xf4   :  { %v2109_v3 = vpop.f32.mrf.mxu0 }
  0xf6   :  { %v2115_v7 = vpop.f32.mrf.mxu0 }
  0xf8   :  { %v2117_v9 = vpop.f32.mrf.mxu0 }
  0xfa   :  { %v2121_v12 = vpop.f32.mrf.mxu0 }
  0xfc   :  { %v2125_v14 = vpop.f32.mrf.mxu0 }
  0xfe   :  { %v1668_v15 = vpop.f32.mrf.mxu0 }
 0x100   :  { %v2129_v17 = vpop.f32.mrf.mxu0 }
 0x102   :  { %v1669_v19 = vpop.f32.mrf.mxu0 }
 0x103   :  { %v477_v50 = vpack.c.bf16 %v1669_v19, %v1668_v15  ;;  %v2200_v15 = vpop.permute.xlu1 %748  ;;  %v1551_v19 = vcombine.low %v673_v57, %v685_v48  ;;  %v625_v57 = vrot.slane %v2139_v24, %v2170_v43  ;;  %v1557_v24 = vcombine.low %v817_v13, %v829_v11 }
 0x104   :  { %v2133_v21 = vpop.f32.mrf.mxu0 }
 0x105   :  { %v1005_v5 = vadd.bf16 %v1552_v38, %v477_v50  ;;  %v476_v53 = vpack.c.bf16 %v2133_v21, %v2129_v17  ;;  %v2363_v17 = vmov 0  }
 0x106   :  { %v2137_v23 = vpop.f32.mrf.mxu0 }
 0x107   :  { %v557_v18 = vpop.permute.xlu1 %556 }
 0x108   :  { %v2141_v25 = vpop.f32.mrf.mxu0 }
 0x10a   :  { %v2143_v26 = vpop.f32.mrf.mxu0 }
 0x10c   :  { %v2147_v28 = vpop.f32.mrf.mxu0 }
 0x10e   :  { %v2151_v30 = vpop.f32.mrf.mxu0 }
 0x110   :  { %v2153_v31 = vpop.f32.mrf.mxu0 }
 0x112   :  { %v2157_v35 = vpop.f32.mrf.mxu0 }
 0x114   :  { %v2161_v37 = vpop.f32.mrf.mxu0 }
 0x116   :  { %v1680_v39 = vpop.f32.mrf.mxu0 }
 0x118   :  { %v2165_v41 = vpop.f32.mrf.mxu0 }
 0x11a   :  { %v1681_v44 = vpop.f32.mrf.mxu0 }
 0x11b   :  { %v483_v1 = vpack.c.bf16 %v1681_v44, %v1680_v39  ;;  %v1021_v39 = vmax.bf16 %v2363_v17, %v1005_v5  ;;  %v613_v5 = vrot.slane %v2155_v32, %v2170_v43  ;;  %v781_v32 = vrot.slane %v2163_v40, %v2170_v43 }
 0x11c   :  { %v442_v47 = vpop.f32.mrf.mxu0 }
 0x11d   :  { %v1011_v44 = vadd.bf16 %v1558_v52, %v483_v1  ;;  %v482_v16 = vpack.c.bf16 %v442_v47, %v2165_v41  ;;  %v545_v52 = vpop.permute.xlu0 %544  ;;  %v474_v47 = vpack.c.bf16 %v2125_v14, %v2117_v9  ;;  %v577_v9 = vrot.slane %v2182_v60, %v2170_v43 }
 0x11e   :  { %v1684_v34 = vpop.f32.mrf.mxu0  ;;  %v589_v14 = vrot.slane %v2176_v33, %v2170_v43  ;;  %v757_v60 = vrot.slane %v2200_v15, %v2170_v43  ;;  %v553_v33 = vrot.slane %v545_v52, %v2170_v43  ;;  %v2364_v1 = vpack.c.bf16 %v2103_v0, %v2097_v61  ;;  %v1733_v52 = vld [vmem:[%s2343_s4] ss:$8 sps:$4 sm:$0xff]  }
 0x11f   :  { %v1010_v49 = vadd.bf16 %v1557_v24, %v482_v16  ;;  %v1027_v27 = vmax.bf16 %v2363_v17, %v1011_v44  ;;  %v2366_v44 = vld [vmem:[#allocation8_spill] sm:$0xff] }
 0x120   :  { %v455_v6 = vpop.f32.mrf.mxu0  ;;  %v2367_v16 = vpack.c.bf16 %v2087_v56, %v2366_v44 }
 0x121   :  { %v1026_v40 = vmax.bf16 %v2363_v17, %v1010_v49  ;;  %v1744_v49 = vld [vmem:[%s2343_s4 + $0x30] ss:$8 sps:$4 sm:$0xff]  }
 0x122   :  { %v1685_v46 = vpop.f32.mrf.mxu0 }
 0x123   :  { %v485_v55 = vpack.c.bf16 %v1685_v46, %v1684_v34  ;;  %v1550_v34 = vcombine.low %v649_v62, %v661_v59  ;;  %v725_v46 = vpop.permute.xlu1 %724  ;;  %v713_v62 = vpop.permute.xlu0 %712 }
 0x124   :  { %v458_v4 = vpop.f32.mrf.mxu0 }
 0x125   :  { %v484_v8 = vpack.c.bf16 %v458_v4, %v455_v6  ;;  %v1013_v20 = vadd.bf16 %v1560_v10, %v485_v55  ;;  %v475_v10 = vpack.c.bf16 %v2121_v12, %v2115_v7  ;;  %v1004_v6 = vadd.bf16 %v1551_v19, %v476_v53 }
 0x126   :  { %v601_v7 = vrot.slane %v2159_v36, %v2170_v43  ;;  %v1549_v12 = vcombine.low %v625_v57, %v637_v2  ;;  %v769_v36 = vrot.slane %v2167_v42, %v2170_v43  ;;  %v480_v42 = vpack.c.bf16 %v2161_v37, %v2153_v31 }
 0x127   :  { %v1012_v38 = vadd.bf16 %v1559_v54, %v484_v8  ;;  %v1029_v21 = vmax.bf16 %v2363_v17, %v1013_v20  ;;  %v793_v54 = vrot.slane %v2149_v29, %v2170_v43  ;;  %v1003_v41 = vadd.bf16 %v1550_v34, %v475_v10  ;;  %v533_v8 = vpop.permute.xlu1 %532 }
 0x128   :  { %v1020_v50 = vmax.bf16 %v2363_v17, %v1004_v6  ;;  %v481_v29 = vpack.c.bf16 %v2157_v35, %v2151_v30  ;;  %v1548_v45 = vcombine.low %v601_v7, %v613_v5  ;;  %v1002_v30 = vadd.bf16 %v1549_v12, %v474_v47  ;;  %v1736_v12 = vld [vmem:[%s2343_s4 + $0x14] ss:$8 sps:$4 sm:$0xff]   ;;  %v1739_v47 = vld [vmem:[%s2343_s4 + $0x24] ss:$8 sps:$4 sm:$0xff]  }
 0x129   :  { %1599 = vmatprep.subr.bf16.mxu1 %v1029_v21  ;;  %v1028_v48 = vmax.bf16 %v2363_v17, %v1012_v38  ;;  %v1556_v51 = vcombine.low %v793_v54, %v805_v22  ;;  %v1019_v35 = vmax.bf16 %v2363_v17, %v1003_v41  ;;  %v1555_v55 = vcombine.low %v769_v36, %v781_v32  ;;  %v521_v38 = vpop.permute.xlu0 %520  ;;  %v2368_v54 = vld [vmem:[#allocation10_spill] sm:$0xff]  ;;  %v2369_v22 = vld [vmem:[#allocation9_spill] sm:$0xff] }
 0x12a   :  { %1600 = vmatpush3.bf16.msra.mxu1 %v1021_v39  ;;  %v745_v19 = vrot.slane %v2204_v58, %v2170_v43  ;;  %v565_v53 = vrot.slane %v557_v18, %v2170_v43  ;;  %v1547_v4 = vcombine.low %v577_v9, %v589_v14  ;;  %v1001_v31 = vadd.bf16 %v1548_v45, %v2364_v1  ;;  %v1738_v41 = vld [vmem:[%s2343_s4 + $0x10] ss:$8 sps:$4 sm:$0xff]  }
 0x12b   :  { %1601 = vmatprep.subr.bf16.mxu1 %v1028_v48  ;;  %v1009_v59 = vadd.bf16 %v1556_v51, %v481_v29  ;;  %v1018_v37 = vmax.bf16 %v2363_v17, %v1002_v30  ;;  %v479_v20 = vpack.c.bf16 %v2143_v26, %v2137_v23  ;;  %v1008_v58 = vadd.bf16 %v1555_v55, %v480_v42  ;;  %v1742_v29 = vld [vmem:[%s2343_s4 + $0x34] ss:$8 sps:$4 sm:$0xff]  }
 0x12c   :  { %v1554_v15 = vcombine.low %v745_v19, %v757_v60  ;;  %v1546_v11 = vcombine.low %v553_v33, %v565_v53  ;;  %v721_v34 = vrot.slane %v713_v62, %v2170_v43  ;;  %v733_v57 = vrot.slane %v725_v46, %v2170_v43 }
 0x12d   :  { %v1025_v13 = vmax.bf16 %v2363_v17, %v1009_v59  ;;  %v529_v61 = vrot.slane %v521_v38, %v2170_v43  ;;  %v541_v0 = vrot.slane %v533_v8, %v2170_v43  ;;  %v2365_v21 = vpack.c.bf16 %v2109_v3, %v2101_v63  ;;  %v1230_v62 = vpop.permute.xlu0 %1229  ;;  %v1242_v59 = vpop.permute.xlu1 %1241 }
 0x12e   :  { %1602 = vmatpush3.bf16.msra.mxu1 %v1020_v50  ;;  %v1017_v26 = vmax.bf16 %v2363_v17, %v1001_v31  ;;  %v1007_v2 = vadd.bf16 %v1554_v15, %v479_v20  ;;  %v478_v10 = vpack.c.bf16 %v2147_v28, %v2141_v25  ;;  %v1024_v6 = vmax.bf16 %v2363_v17, %v1008_v58  ;;  %v1741_v50 = vld [vmem:[%s2343_s4 + $0x20] ss:$8 sps:$4 sm:$0xff]  }
 0x12f   :  { %1603 = vmatprep.subr.bf16.mxu1 %v1027_v27  ;;  %v1000_v23 = vadd.bf16 %v1547_v4, %v2365_v21  ;;  %v1553_v39 = vcombine.low %v721_v34, %v733_v57  ;;  %v1545_v18 = vcombine.low %v529_v61, %v541_v0  ;;  %v999_v48 = vadd.bf16 %v1546_v11, %v2367_v16  ;;  %v1745_v27 = vld [vmem:[%s2345_s6] sm:$0xff]  }
 0x130   :  { %v1023_v3 = vmax.bf16 %v2363_v17, %v1007_v2  ;;  %v2370_v25 = vpack.c.bf16 %v2368_v54, %v2369_v22  ;;  %v1238_v1 = vrot.slane %v1230_v62, %v2170_v43 }
 0x131   :  { %v1016_v24 = vmax.bf16 %v2363_v17, %v1000_v23  ;;  %v1006_v63 = vadd.bf16 %v1553_v39, %v478_v10  ;;  %v1015_v7 = vmax.bf16 %v2363_v17, %v999_v48  ;;  %v1206_v19 = vpop.permute.xlu0 %1205  ;;  %v1218_v60 = vpop.permute.xlu1 %1217 }
 0x132   :  { %1604 = vmatpush3.bf16.msra.mxu1 %v1019_v35  ;;  %v998_v28 = vadd.bf16 %v1545_v18, %v2370_v25  ;;  %v1214_v8 = vrot.slane %v1206_v19, %v2170_v43  ;;  %v1226_v20 = vrot.slane %v1218_v60, %v2170_v43 }
 0x133   :  { %1605 = vmatprep.subr.bf16.mxu1 %v1026_v40  ;;  %v1022_v5 = vmax.bf16 %v2363_v17, %v1006_v63 }
 0x134   :  { %v1014_v56 = vmax.bf16 %v2363_v17, %v998_v28 }
 0x135   :  { %v1182_v58 = vpop.permute.xlu0 %1181  ;;  %v1194_v15 = vpop.permute.xlu1 %1193 }
 0x136   :  { %1606 = vmatpush3.bf16.msra.mxu1 %v1018_v37  ;;  %v1250_v37 = vrot.slane %v1242_v59, %v2170_v43  ;;  %v1190_v0 = vrot.slane %v1182_v58, %v2170_v43  ;;  %v1202_v21 = vrot.slane %v1194_v15, %v2170_v43 }
 0x137   :  { %1607 = vmatprep.subr.bf16.mxu1 %v1025_v13 }
 0x138   :  { %v1572_v23 = vcombine.low %v1238_v1, %v1250_v37  ;;  %v1570_v16 = vcombine.low %v1190_v0, %v1202_v21 }
 0x139   :  { %v1158_v48 = vpop.permute.xlu0 %1157 }
 0x13a   :  { %1608 = vmatpush3.bf16.msra.mxu1 %v1017_v26  ;;  %v1571_v26 = vcombine.low %v1214_v8, %v1226_v20  ;;  %v1166_v63 = vrot.slane %v1158_v48, %v2170_v43 }
 0x13b   :  { %1609 = vmatprep.subr.bf16.mxu1 %v1024_v6 }
 0x13e   :  { %1610 = vmatpush3.bf16.msra.mxu1 %v1016_v24  ;;  %v1170_v24 = vpop.permute.xlu1 %1169 }
 0x13f   :  { %1611 = vmatprep.subr.bf16.mxu1 %v1023_v3  ;;  %v1178_v3 = vrot.slane %v1170_v24, %v2170_v43 }
 0x142   :  { %1612 = vmatpush3.bf16.msra.mxu1 %v1015_v7 }
 0x143   :  { %1613 = vmatprep.subr.bf16.mxu1 %v1022_v5  ;;  %v1569_v5 = vcombine.low %v1166_v63, %v1178_v3 }
 0x146   :  { %1614 = vmatpush3.bf16.msra.mxu1 %v1014_v56 }
 0x149   :  { %1111 = vmatmul.mubr.bf16.vlgmr.msra.gmra.mxu1 %v1733_v52 }
 0x14a   :  { %1118 = vmatprep.mubr.bf16.mxu1 %v1736_v12 }
 0x151   :  { %1119 = vmatmul.mubr.bf16.gmra.mxu1 %v1738_v41  ;;  %v1746_v41 = vld [vmem:[%s2345_s6 + $0x8] sm:$0xff]  }
 0x152   :  { %1126 = vmatprep.mubr.bf16.mxu1 %v1739_v47  ;;  %v2371_v47 = vmov 0.0  }
 0x159   :  { %1127 = vmatmul.mubr.bf16.gmra.mxu1 %v1741_v50  ;;  %v1398_v50 = vpop.permute.xlu1 %1397 }
 0x15a   :  { %1134 = vmatprep.mubr.bf16.mxu1 %v1742_v29  ;;  %v1386_v29 = vpop.permute.xlu0 %1385 }
 0x161   :  { %1135 = vmatmul.mubr.bf16.gmra.mxu1 %v1744_v49  ;;  %v1374_v49 = vpop.permute.xlu1 %1373 }
 0x162   :  { %1694 = vmatprep.mubr.msk.bf16.mxu1 %vm1297_vm15, %v1745_v27 }
 0x209   :  { %v1615_v36 = vpop.f32.mrf.mxu1 }
 0x20b   :  { %v1616_v32 = vpop.f32.mrf.mxu1 }
 0x20c   :  { %v1617_v54 = vadd.f32 %v1616_v32, %v1615_v36  ;;  %v1394_v36 = vrot.slane %v1386_v29, %v2170_v43  ;;  %v1406_v32 = vrot.slane %v1398_v50, %v2170_v43 }
 0x20d   :  { %v1618_v51 = vpop.f32.mrf.mxu1 }
 0x20f   :  { %v1619_v45 = vpop.f32.mrf.mxu1 }
 0x210   :  { %v1620_v6 = vadd.f32 %v1619_v45, %v1618_v51  ;;  %v1362_v51 = vpop.permute.xlu0 %1361 }
 0x211   :  { %v1621_v46 = vpop.f32.mrf.mxu1 }
 0x212   :  { %v1143_v25 = vpack.c.bf16 %v1620_v6, %v1617_v54 }
 0x213   :  { %v1622_v9 = vpop.f32.mrf.mxu1 }
 0x214   :  { %v1623_v2 = vadd.f32 %v1622_v9, %v1621_v46  ;;  %v1275_v56 = vadd.bf16 %v1569_v5, %v1143_v25  ;;  %v1370_v46 = vrot.slane %v1362_v51, %v2170_v43  ;;  %v1382_v9 = vrot.slane %v1374_v49, %v2170_v43  ;;  %v1423_v43 = vld [vmem:[%s2347_s8] sm:$0x1] }
 0x215   :  { %v1624_v14 = vpop.f32.mrf.mxu1 }
 0x216   :  { %v1279_v12 = vmax.bf16 %v2363_v17, %v1275_v56  ;;  %v1577_v59 = vcombine.low %v1370_v46, %v1382_v9 }
 0x217   :  { %v1625_v30 = vpop.f32.mrf.mxu1 }
 0x218   :  { %v1626_v34 = vadd.f32 %v1625_v30, %v1624_v14  ;;  %v1578_v30 = vcombine.low %v1394_v36, %v1406_v32 }
 0x219   :  { %v1627_v35 = vpop.f32.mrf.mxu1 }
 0x21a   :  { %v1144_v39 = vpack.c.bf16 %v1626_v34, %v1623_v2 }
 0x21b   :  { %v1628_v42 = vpop.f32.mrf.mxu1 }
 0x21c   :  { %v1629_v13 = vadd.f32 %v1628_v42, %v1627_v35  ;;  %v1276_v28 = vadd.bf16 %v1570_v16, %v1144_v39 }
 0x21d   :  { %v1630_v40 = vpop.f32.mrf.mxu1 }
 0x21e   :  { %v1280_v52 = vmax.bf16 %v2363_v17, %v1276_v28 }
 0x21f   :  { %v1631_v55 = vpop.f32.mrf.mxu1 }
 0x220   :  { %v1632_v4 = vadd.f32 %v1631_v55, %v1630_v40 }
 0x221   :  { %v1633_v33 = vpop.f32.mrf.mxu1 }
 0x222   :  { %v1145_v57 = vpack.c.bf16 %v1632_v4, %v1629_v13 }
 0x223   :  { %v1634_v53 = vpop.f32.mrf.mxu1 }
 0x224   :  { %v1635_v38 = vadd.f32 %v1634_v53, %v1633_v33  ;;  %v1277_v18 = vadd.bf16 %v1571_v26, %v1145_v57  ;;  %v1428_v33 = vpop.permute.xlu0 %1427  ;;  %v2372_v53 = vld [vmem:[#allocation7_spill] sm:$0xff] }
 0x225   :  { %v1636_v31 = vpop.f32.mrf.mxu1  ;;  %v2373_v4 = vsub.s32 0, %v2372_v53 }
 0x226   :  { %v1281_v7 = vmax.bf16 %v2363_v17, %v1277_v18 }
 0x227   :  { %v1637_v11 = vpop.f32.mrf.mxu1  ;;  %v1433_v1 = vrot.slane %v1428_v33, %v2373_v4 }
 0x228   :  { %v1638_v61 = vadd.f32 %v1637_v11, %v1636_v31 }
 0x22a   :  { %v1146_v10 = vpack.c.bf16 %v1638_v61, %v1635_v38 }
 0x22c   :  { %v1278_v44 = vadd.bf16 %v1572_v23, %v1146_v10 }
 0x22e   :  { %v1282_v22 = vmax.bf16 %v2363_v17, %v1278_v44 }
 0x230   :  { %1686 = vmatprep.subr.bf16.mxu1 %v1282_v22 }
 0x231   :  { %1687 = vmatpush3.bf16.msra.mxu1 %v1282_v22 }
 0x232   :  { %1688 = vmatprep.subr.bf16.mxu1 %v1281_v7 }
 0x235   :  { %1689 = vmatpush3.bf16.msra.mxu1 %v1281_v7 }
 0x236   :  { %1690 = vmatprep.subr.bf16.mxu1 %v1280_v52 }
 0x239   :  { %1691 = vmatpush3.bf16.msra.mxu1 %v1280_v52 }
 0x23a   :  { %1692 = vmatprep.subr.bf16.mxu1 %v1279_v12 }
 0x23d   :  { %1693 = vmatpush3.bf16.msra.mxu1 %v1279_v12 }
 0x23e   :  { %1698 = vmatprep.subr.bf16.mxu1 %v2371_v47 }
 0x240   :  { %1695 = vmatmul.mubr.msk.bf16.vlgmr.msra.gmra.mxu1 %vm1297_vm15, %v1746_v41 }
 0x241   :  { %1702 = vmatprep.mubr.msk.bf16.mxu1 %vm1772_vm0, %v2371_v47 }
 0x300   :  { %v1696_v27 = vpop.f32.mrf.mxu1 }
 0x302   :  { %v1338_v45 = vpop.f32.mrf.mxu1 }
 0x304   :  { %v1697_v14 = vpop.f32.mrf.mxu1 }
 0x305   :  { %v1354_v35 = vpack.c.bf16 %v1697_v14, %v1696_v27 }
 0x306   :  { %v1341_v62 = vpop.f32.mrf.mxu1 }
 0x307   :  { %v1420_v42 = vadd.bf16 %v1578_v30, %v1354_v35  ;;  %v1353_v40 = vpack.c.bf16 %v1341_v62, %v1338_v45 }
 0x309   :  { %v1422_v55 = vmax.bf16 %v2363_v17, %v1420_v42  ;;  %v1419_v19 = vadd.bf16 %v1577_v59, %v1353_v40 }
 0x30b   :  { %1699 = vmatpush3.bf16.msra.mxu1 %v1422_v55  ;;  %v1421_v60 = vmax.bf16 %v2363_v17, %v1419_v19 }
 0x30c   :  { %1700 = vmatprep.subr.bf16.mxu1 %v2371_v47 }
 0x30f   :  { %1701 = vmatpush3.bf16.msra.mxu1 %v1421_v60 }
 0x312   :  { %1703 = vmatmul.mubr.msk.bf16.vlgmr.msra.gmra.mxu1 %vm1434_vm1, %v1423_v43 }
 0x3d2   :  { %v1472_v31 = vpop.f32.mrf.mxu1 }
 0x3d3   :  { %v1473_v37 = vadd.f32 %v1472_v31, %v1433_v1 }
 0x3d4   :  { %v1704_v8 = vpop.f32.mrf.mxu1 }
 0x3d5   :  { %1479 = vst.msk [vmem:[#allocation4] sm:$0x1] %vm1478_vm2, %v1473_v37 }
 0x3d6   :  { %v1475_v17 = vpop.f32.mrf.mxu1 }
 0x3d7   :  { %1758 = shalt.err (!%p1755_p4)
}
 0x3d8   :  { %1489 = dma.vmem_to_hbm [thread:$0]  %s1487_s17, 16, %s2349_s10, [#allocation5]   ;;  %v1705_v20 = vpop.f32.mrf.mxu1 }
 0x3d9   :  { %1767 = dma.done.wait [#allocation5], 16  }
 0x3da   :  { %1768 = vsyncadd [#allocation5], 4294967280 }
 0x3db   :  { %1493 = vsyncpa [#allocation5], 1 }

</bundles_post_ra>
